<compile_context>
chip_gen: v5e
topology: v5e:2x2
jax: 0.10.0
libtpu: 0.0.40
codegen_flags: <defaults>
</compile_context>

<pallas_src>
import functools

import jax
import jax.numpy as jnp
from jax.experimental import pallas as pl
from jax.experimental.pallas import tpu as pltpu

LANE = 128
BASE_SUBLANE = 8                        # f32 sublanes; bf16/int8 pack 2x/4x rows
TARGET_TILE_BYTES = 2 * 1024 * 1024     # ~2 MiB tiles -> near HBM roofline
DEFAULT_MIN_KERNEL_ELEMS = 256 * 1024   # below this, fused XLA elementwise wins


def _softplus_kernel(x_ref, o_ref, *, beta, inv_beta, threshold, compute_dtype):
    x = x_ref[...].astype(compute_dtype)
    z = x * beta
    # Numerically stable log1p(exp(z)) = max(z, 0) + log1p(exp(-|z|))
    # TODO(synk): on v5e, if a bundle dump shows the EUP slot saturating, move
    # log1p onto the VPU via a minimax polynomial in t = exp(-|z|) over (0, 1].
    sp = (jnp.maximum(z, 0) + jnp.log1p(jnp.exp(-jnp.abs(z)))) * inv_beta
    o_ref[...] = jnp.where(z > threshold, x, sp).astype(o_ref.dtype)


def _softplus_ref(x, beta, threshold):
    """Plain-JAX reference (also the small-input bypass / ragged-tail path)."""
    xf = x.astype(jnp.float32)
    z = xf * beta
    sp = (jnp.maximum(z, 0.0) + jnp.log1p(jnp.exp(-jnp.abs(z)))) / beta
    return jnp.where(z > threshold, xf, sp).astype(x.dtype)


def _bf16_vector_math_supported():
    """bf16 EUP/VPU exists on v6e and newer; v5e/v4 and older need f32 math."""
    try:
        kind = jax.devices()[0].device_kind.lower()
    except Exception:
        return False
    return not any(tag in kind for tag in ("v2", "v3", "v4", "v5"))


def _choose_tile_rows(rows, sublane, block_rows):
    """>=2 (even-count) roughly-equal, sublane-aligned blocks, each <= block_rows."""
    nb = max(2, -(-rows // block_rows))        # cdiv
    if nb % 2:
        nb += 1                                # even grid: balanced on v7x's 2 TCs
    tr = -(-rows // nb)
    tr = -(-tr // sublane) * sublane           # round up to sublane multiple
    return max(sublane, min(tr, block_rows))


def softplus(x, beta=1.0, threshold=20.0, *, block_rows=None,
             min_kernel_elems=DEFAULT_MIN_KERNEL_ELEMS):
    """Element-wise Softplus matching torch.nn.Softplus(beta, threshold) semantics."""
    assert beta > 0
    orig_shape = x.shape
    orig_dtype = x.dtype
    n = x.size
    if n == 0:
        return x

    itemsize = jnp.dtype(orig_dtype).itemsize
    sublane = BASE_SUBLANE * max(1, 4 // max(1, itemsize))
    if block_rows is None:
        block_rows = max(sublane, TARGET_TILE_BYTES // (LANE * itemsize))

    n_main = (n // LANE) * LANE  # lane-aligned prefix covered by the kernel
    # Small-input bypass: pallas_call dispatch + pipeline ramp dominates there.
    if n < max(1, min_kernel_elems) or n_main < LANE * sublane:
        return _softplus_ref(x, beta, threshold)

    use_bf16_math = (orig_dtype == jnp.bfloat16) and _bf16_vector_math_supported()
    compute_dtype = jnp.bfloat16 if use_bf16_math else jnp.float32

    x_flat = x.reshape(-1)                                    # zero-copy
    x_main = x_flat if n_main == n else jax.lax.slice(x_flat, (0,), (n_main,))
    rows = n_main // LANE
    x2d = x_main.reshape(rows, LANE)                          # zero-copy

    tr = _choose_tile_rows(rows, sublane, block_rows)
    grid = (pl.cdiv(rows, tr),)            # partial last block is masked by Pallas

    kernel = functools.partial(
        _softplus_kernel,
        beta=float(beta),
        inv_beta=1.0 / float(beta),
        threshold=float(threshold),
        compute_dtype=compute_dtype,
    )

    out2d = pl.pallas_call(
        kernel,
        out_shape=jax.ShapeDtypeStruct((rows, LANE), orig_dtype),
        grid_spec=pltpu.PrefetchScalarGridSpec(
            num_scalar_prefetch=0,
            grid=grid,
            in_specs=[pl.BlockSpec((tr, LANE), lambda i: (i, 0))],
            out_specs=pl.BlockSpec((tr, LANE), lambda i: (i, 0)),
        ),
        compiler_params=pltpu.CompilerParams(
            dimension_semantics=("parallel",)),
        cost_estimate=pl.CostEstimate(
            flops=8 * n_main,
            transcendentals=2 * n_main,
            bytes_accessed=2 * n_main * itemsize),
    )(x2d)

    out_main = out2d.reshape(-1)
    if n_main == n:
        return out_main.reshape(orig_shape)
    # <128-element ragged tail handled on the XLA path, stitched back on.
    tail = jax.lax.slice(x_flat, (n_main,), (n,))
    out_tail = _softplus_ref(tail, beta, threshold)
    return jnp.concatenate([out_main, out_tail]).reshape(orig_shape)


if __name__ == "__main__":
    key = jax.random.PRNGKey(0)
    k1, k2, k3, k4 = jax.random.split(key, 4)

    # Small module-like NCHW input; force the Pallas path (below the default
    # small-input bypass) so the kernel itself is exercised at this shape.
    # Scale so some values exceed threshold=20 (exercises the linear passthrough).
    x = jax.random.normal(k1, (2, 4, 16, 16), dtype=jnp.float32) * 10.0
    y = softplus(x, min_kernel_elems=0)
    jax.block_until_ready(y)
    y_ref = _softplus_ref(x, 1.0, 20.0)
    assert y.shape == x.shape and y.dtype == x.dtype
    assert jnp.allclose(y, y_ref, rtol=1e-6, atol=1e-6), "f32 mismatch with reference"

    # Medium f32 input at/above the default bypass threshold: default kernel path,
    # exact multiple of 128 (fully zero-copy reshape), even 2-block parallel grid.
    xm = jax.random.normal(k2, (4, 8, 64, 128), dtype=jnp.float32) * 10.0
    ym = softplus(xm)
    jax.block_until_ready(ym)
    assert jnp.allclose(ym, _softplus_ref(xm, 1.0, 20.0), rtol=1e-6, atol=1e-6), \
        "f32 (default path) mismatch with reference"

    # Ragged bf16 input with non-default beta/threshold: exercises the lane-aligned
    # prefix + XLA tail stitching, dtype-aware sublane tiling, partial last block,
    # and (on v6e/v7x) the bf16-internal transcendental path.
    xb = (jax.random.normal(k3, (8, 257, 33), dtype=jnp.float32) * 8.0).astype(jnp.bfloat16)
    yb = softplus(xb, beta=2.0, threshold=10.0, min_kernel_elems=0)
    jax.block_until_ready(yb)
    yb_ref = _softplus_ref(xb, 2.0, 10.0)
    assert yb.shape == xb.shape and yb.dtype == xb.dtype
    assert jnp.allclose(yb.astype(jnp.float32), yb_ref.astype(jnp.float32),
                        rtol=2e-2, atol=2e-2), "bf16 mismatch with reference"

    # Tiny input takes the fused-XLA bypass path.
    xt = jax.random.normal(k4, (7,), dtype=jnp.float32)
    yt = softplus(xt)
    jax.block_until_ready(yt)
    assert jnp.allclose(yt, _softplus_ref(xt, 1.0, 20.0))

    print("KERNEL_OK")
</pallas_src>

<mosaic_0001>
module attributes {stable_mosaic.version = 11 : i64} {
  func.func @_softplus_kernel(%arg0: i32, %arg1: memref<8x128xf32, #tpu.memory_space<vmem>>, %arg2: memref<8x128xf32, #tpu.memory_space<vmem>>) attributes {dimension_semantics = [#tpu.dimension_semantics<parallel>], iteration_bounds = array<i64: 2>, scalar_prefetch = 0 : i64, scratch_operands = 0 : i64, tpu.core_type = #tpu.core_type<tc>, window_params = [{transform_indices = @transform_0, window_bounds = array<i64: 8, 128>}, {transform_indices = @transform_1, window_bounds = array<i64: 8, 128>}]} {
    %c0 = arith.constant 0 : index
    %c0_0 = arith.constant 0 : index
    %0 = vector.load %arg1[%c0, %c0_0] : memref<8x128xf32, #tpu.memory_space<vmem>>, vector<8x128xf32>
    %cst = arith.constant 1.000000e+00 : f32
    %1 = vector.broadcast %cst : f32 to vector<8x128xf32>
    %2 = arith.mulf %0, %1 : vector<8x128xf32>
    %cst_1 = arith.constant 0.000000e+00 : f32
    %3 = vector.broadcast %cst_1 : f32 to vector<8x128xf32>
    %4 = arith.maximumf %2, %3 : vector<8x128xf32>
    %5 = math.absf %2 : vector<8x128xf32>
    %cst_2 = arith.constant 0.000000e+00 : f32
    %6 = vector.broadcast %cst_2 : f32 to vector<8x128xf32>
    %7 = arith.subf %6, %5 : vector<8x128xf32>
    %8 = math.exp %7 : vector<8x128xf32>
    %9 = math.log1p %8 : vector<8x128xf32>
    %10 = arith.addf %4, %9 : vector<8x128xf32>
    %cst_3 = arith.constant 1.000000e+00 : f32
    %11 = vector.broadcast %cst_3 : f32 to vector<8x128xf32>
    %12 = arith.mulf %10, %11 : vector<8x128xf32>
    %cst_4 = arith.constant 2.000000e+01 : f32
    %13 = vector.broadcast %cst_4 : f32 to vector<8x128xf32>
    %14 = arith.cmpf ogt, %2, %13 : vector<8x128xf32>
    %15 = arith.select %14, %0, %12 : vector<8x128xi1>, vector<8x128xf32>
    %c0_5 = arith.constant 0 : index
    %c0_6 = arith.constant 0 : index
    %16 = vector.load %arg2[%c0_5, %c0_6] : memref<8x128xf32, #tpu.memory_space<vmem>>, vector<8x128xf32>
    tpu.vector_store %arg2[%c0_5, %c0_6], %15 {strides = array<i32>} : memref<8x128xf32, #tpu.memory_space<vmem>>, vector<8x128xf32>,
    return
  }
  func.func @transform_0(%arg0: i32) -> (i32, i32) {
    %c0_i32 = arith.constant 0 : i32
    %c0_i32_0 = arith.constant 0 : i32
    return %arg0, %c0_i32 : i32, i32
  }
  func.func @transform_1(%arg0: i32) -> (i32, i32) {
    %c0_i32 = arith.constant 0 : i32
    %c0_i32_0 = arith.constant 0 : i32
    return %arg0, %c0_i32 : i32, i32
  }
}

</mosaic_0001>

<bundles_post_ra>
// kernel: tpu_custom_call.1
= control target key start
LH: loop header
LB: loop body
LE: loop exit
PB: predicated region body
PF: predicated region fallthrough
CT: control target
= control target key end

     0   :  { %6 = vsyncpa [#allocation3], 0  ;;  %s536_s0 = inlined_call_operand.hbm [shape: f32[16,128], index: 0, kind: input, shape index: {}]   ;;  %s537_s1 = inlined_call_operand.hbm [shape: f32[16,128], index: 1, kind: output, shape index: {}]  }
   0x1   :  { %8 = vsyncpa [#allocation3 + $0x1], 0 }
   0x2   :  { %9 = vsyncpa [#allocation4], 0 }
   0x3   :  { %11 = vsyncpa [#allocation4 + $0x1], 0  ;;  %s409_s6 = smov 0   ;;  %s411_s7 = smov 0  }
   0x4   :  { %s413_s8 = smov 0   ;;  %s415_s9 = smov 0  }
   0x5 LB: > { %s430_s10 = sadd.s32 4294967295, %s397_s9   ;;  %s239_s11 = sadd.s32 4294967294, %s397_s9   ;;  %s397_s9 = sphi %s415_s9, %s547_s9   ;;  %s393_s8 = sphi %s413_s8, %s546_s8   ;;  %s389_s7 = sphi %s411_s7, %s545_s7   ;;  %s385_s6 = sphi %s409_s6, %s544_s6  }
   0x6   : > { %s434_s12 = sadd.s32 1, %s397_s9   ;;  %s24_s13 = sadd.s32 1, %s393_s8 }
   0x7   : > { %s21_s14 = ssub.s32 %s397_s9, %s434_s12  ;;  %p31_p0 = scmp.ne.s32.totalorder %s393_s8, %s389_s7 }
   0x8   : > { %p22_p1 = scmp.eq.s32.totalorder %s21_s14, 0  ;;  %p32_p2 = scmp.eq.s32.totalorder %s397_s9, 0 }
   0x9   : > { %p37_p3 = scmp.ne.s32.totalorder %s389_s7, %s385_s6  ;;  %p38_p4 = scmp.eq.s32.totalorder %s430_s10, 0 }
   0xa   : > { %s446_s15 = scalar_select %p22_p1, %s393_s8, %s24_s13  }
   0xb   : > { %p448_p5 = por %p32_p2, %p31_p0  ;;  %p452_p6 = por %p38_p4, %p37_p3 }
   0xc   : > { %p61_p7 = scmp.eq.s32.totalorder %s430_s10, 1  ;;  %p67_p8 = scmp.eq.s32.totalorder %s239_s11, 1 }
   0xd   : > { %p263_p10 = scmp.lt.s32.totalorder %s397_s9, 2  ;;  %s87_s20 = sand.u32 1, %s393_s8  }
   0xe   : > { %p459_p11 = por %p61_p7, %p31_p0  ;;  %p463_p12 = por %p67_p8, %p37_p3 }
   0xf   : > { %s243_s21 = sshll.u32 %s397_s9, 3  ;;  %s242_s22 = sshll.u32 %s87_s20, 3 }
  0x10   : > { %s95_s25 = scalar_lea.hbm %s536_s0, %s243_s21  ;;  %s91_s27 = scalar_lea.vmem [#allocation2], %s242_s22 }
  0x11   : > { %s97_s26 = sshll.u32 %s95_s25, 4  ;;  %s99_s28 = sshll.u32 %s91_s27, 4  ;;  %s98_s26 = int_to_ptr.hbm [resolvable:$true] %s97_s26  ;;  %s100_s28 = int_to_ptr.vmem [resolvable:$true] %s99_s28 }
  0x12   : > { %p474_p13 = pnand %p263_p10, %p448_p5  ;;  %p244_p0 = scmp.ge.s32.totalorder %s397_s9, 1 }
  0x13   : > { %p104_p1 = scmp.lt.s32.totalorder %s397_s9, 3  ;;  %s88_s30 = scalar_lea.sflag [#allocation3], %s87_s20 }
  0x14   : > { %s301_s2 = sshra.s32 %s98_s26, 4  ;;  %p305_p3 = pneg %p474_p13  ;;  %s302_s2 = int_to_ptr.hbm [resolvable:$true] %s301_s2 }
  0x15   : > { %s303_s3 = scalar_lea.hbm %s302_s2, 8  ;;  %s308_s11 = scalar_lea.hbm %s536_s0, 16 }
  0x16   : > { %p304_p2 = scmp.ne.s32.totalorder %s302_s2, %s303_s3  ;;  %p309_p5 = scmp.lt.s32.totalorder %s302_s2, %s536_s0 }
  0x17   : > { %p310_p8 = scmp.lt.s32.totalorder %s308_s11, %s303_s3 }
  0x18   : > { %p306_p4 = pnand %p305_p3, %p304_p2 }
  0x19   : > { %p311_p10 = por %p310_p8, %p309_p5 }
  0x1a   : > { %p307_p7 = pneg %p306_p4 }
  0x1c   : > { %p312_p9 = pnand %p311_p10, %p307_p7 }
  0x1e   : > { %315 = shalt.err (!%p312_p9)
}
  0x1f   : > { %258 = dma.hbm_to_vmem [thread:$0]  (!%p474_p13), %s98_s26, 128, %s100_s28, %s88_s30  }
  0x20   : > { %p105_p2 = pnand %p244_p0, %p104_p1 }
  0x21   : > { %s495_s16 = sand.u32 (!%p105_p2), 1, %s389_s7  }
  0x22   : > { %108 = sbr.rel (%p105_p2) target bundleno = 72 (0x48), region = 24  ;;  %s245_s20 = sshll.u32 (!%p105_p2), %s495_s16, 3 }
  0x23   : > { %s111_s21 = scalar_lea.sflag (!%p105_p2), [#allocation3], %s495_s16  ;;  %s114_s22 = scalar_lea.vmem (!%p105_p2), [#allocation2], %s245_s20 }
  0x27   : > { %376 = dma.done.wait (%p452_p6), %s111_s21, 128  }
  0x28   : > { %378 = vsyncadd (%p452_p6), %s111_s21, 4294967168  ;;  %v134_v0 = vld [vmem:[%s114_s22] sm:$0xff]  ;;  %s248_s23 = sshll.u32 %s430_s10, 3  ;;  %s133_s26 = scalar_lea.vmem [#allocation5], %s245_s20 }
  0x29   : > { %v136_v1 = vand.u32 2147483647, %v134_v0  ;;  %s164_s17 = scalar_lea.hbm %s537_s1, %s248_s23  ;;  %v135_v11 = vmax.f32 %v134_v0, 0.0  ;;  %s166_s27 = sshll.u32 %s133_s26, 4  ;;  %vm150_vm1 = vcmp.gt.f32.partialorder %v134_v0, 20.0  ;;  %s167_s27 = int_to_ptr.vmem [resolvable:$true] %s166_s27 }
  0x2a   : > { %s168_s28 = sshll.u32 %s164_s17, 4  ;;  %s154_s10 = scalar_lea.sflag [#allocation4], %s495_s16  ;;  %s169_s28 = int_to_ptr.hbm [resolvable:$true] %s168_s28 }
  0x2b   : > { %v137_v2 = vsub.f32 0.0, %v136_v1  ;;  %s345_s29 = sshra.s32 %s169_s28, 4  ;;  %s351_s4 = scalar_lea.hbm %s537_s1, 16  ;;  %s346_s29 = int_to_ptr.hbm [resolvable:$true] %s345_s29 }
  0x2c   : > { %s347_s30 = scalar_lea.hbm %s346_s29, 8  ;;  %p352_p0 = scmp.lt.s32.totalorder %s346_s29, %s537_s1 }
  0x2d   : > { %v138_v3 = vmul.f32 1.442695, %v137_v2  ;;  %p348_p6 = scmp.ne.s32.totalorder %s346_s29, %s347_s30  ;;  %p353_p1 = scmp.lt.s32.totalorder %s351_s4, %s347_s30 }
  0x2f   : > { %297 = vpow2.f32 %v138_v3  ;;  %p349_p9 = pnand %p348_p6, %p459_p11  ;;  %p354_p3 = por %p353_p1, %p352_p0 }
  0x31   : > { %p350_p13 = pneg %p349_p9 }
  0x33   : > { %p355_p4 = pnand %p354_p3, %p350_p13 }
  0x35   : > { %v298_v4 = vpop.eup %297 }
  0x36   : > { %v140_v5 = vadd.f32 1.0, %v298_v4  ;;  %v143_v6 = vmul.f32 -0.5, %v298_v4  ;;  %v146_v8 = vand.u32 2147483647, %v298_v4 }
  0x38   : > { %299 = vlog2.f32 %v140_v5  ;;  %v144_v7 = vadd.f32 1.0, %v143_v6  ;;  %vm147_vm0 = vcmp.lt.f32.partialorder %v146_v8, 0.0004427343 }
  0x3a   : > { %v145_v9 = vmul.f32 %v298_v4, %v144_v7 }
  0x3e   : > { %v300_v10 = vpop.eup %299 }
  0x3f   : > { %v142_v12 = vmul.f32 0.6931472, %v300_v10 }
  0x41   : > { %v148_v13 = vsel %vm147_vm0, %v145_v9, %v142_v12 }
  0x42   : > { %v149_v14 = vadd.f32 %v148_v13, %v135_v11 }
  0x44   : > { %v151_v15 = vsel %vm150_vm1, %v134_v0, %v149_v14 }
  0x45   : > { %152 = vst [vmem:[%s133_s26] sm:$0xff] %v151_v15 }
  0x46   : > { %358 = shalt.err (!%p355_p4)
}
  0x47   : > { %253 = dma.vmem_to_hbm [thread:$0]  (%p459_p11), %s167_s27, 128, %s169_s28, %s154_s10  }
  0x48 PF: > { %s180_s13 = sand.u32 1, %s385_s6   ;;  %p543_p7 = scmp.ge.s32.totalorder %s397_s9, 2 }
  0x49   : > { %s181_s14 = scalar_lea.sflag [#allocation4], %s180_s13 }
  0x4a   : > { %p260_p5 = pnand %p543_p7, %p463_p12 }
  0x4c   : > { %p261_p8 = pneg %p260_p5 }
  0x4e   : > { %380 = dma.done.wait (%p261_p8), %s181_s14, 128  }
  0x4f   : > { %382 = vsyncadd (%p261_p8), %s181_s14, 4294967168  ;;  %p14_p10 = scmp.ge.s32.totalorder %s434_s12, 4   ;;  %s544_s6 = smov %s389_s7 }
  0x50   : > { %s545_s7 = smov %s393_s8  ;;  %s546_s8 = smov %s446_s15 }
  0x51   : > { %s547_s9 = smov %s434_s12  ;;  %16 = sbr.rel (!%p14_p10) target bundleno = 5 (0x5), region = 69 }
  0x56   :  { %187 = vsyncpa [#allocation3], 1 }
  0x57   :  { %189 = vsyncpa [#allocation3 + $0x1], 1 }
  0x58   :  { %190 = vsyncpa [#allocation4], 1 }
  0x59   :  { %192 = vsyncpa [#allocation4 + $0x1], 1 }

</bundles_post_ra>
